<compile_context>
chip_gen: v5e
topology: v5e:2x2
jax: 0.10.0
libtpu: 0.0.40
codegen_flags: <defaults>
</compile_context>

<pallas_src>
import functools

import jax
import jax.numpy as jnp
from jax.experimental import pallas as pl
from jax.experimental.pallas import tpu as pltpu

LN_EPS = 1e-5  # PyTorch nn.LayerNorm default


def _patch_merge_kernel(xme_ref, xhe_ref, xmo_ref, xho_ref, w_ref, p_ref,
                        o_ref, *, C, N, T, Wo):
    """One (batch, output-row-block) tile.

    xme_ref: (1, T, 2, Wc, C)  even-W-phase rows, pairs (i = hb*T + t, ph in {0,1})
    xhe_ref: (1, 1, 1, Wc, C)  even-W-phase halo row (i = (hb+1)*T, ph = 0)
    xmo_ref: (1, T, 2, Wc, C)  odd-W-phase rows
    xho_ref: (1, 1, 1, Wc, C)  odd-W-phase halo row
    w_ref:   (9*C, Np)         flattened conv weight, zero-padded to Np lanes
    p_ref:   (8, Np)           row 0 = conv bias, row 1 = LN gamma, row 2 = LN beta
    o_ref:   (T*Wo, Np)
    """
    Np = o_ref.shape[-1]
    M = T * Wo
    mains = (xme_ref, xmo_ref)
    halos = (xhe_ref, xho_ref)

    # Stride-2 3x3 conv == 9 accumulated (M, C) @ (C, Np) MXU dots over unit-stride taps.
    acc = jnp.zeros((M, Np), jnp.float32)
    for kh in range(3):
        for kw in range(3):
            pw, dj = kw % 2, kw // 2
            m_ref = mains[pw]
            if kh < 2:
                rows = m_ref[0, :, kh, dj:dj + Wo, :]                # (T, Wo, C)
            else:
                last = halos[pw][0, 0, 0, dj:dj + Wo, :][None]       # (1, Wo, C)
                if T > 1:
                    top = m_ref[0, 1:T, 0, dj:dj + Wo, :]            # (T-1, Wo, C)
                    rows = jnp.concatenate([top, last], axis=0)
                else:
                    rows = last
            k0 = (kh * 3 + kw) * C
            acc = acc + jnp.dot(rows.reshape(M, C), w_ref[k0:k0 + C, :],
                                preferred_element_type=jnp.float32)

    bias = p_ref[0:1, :]
    gamma = p_ref[1:2, :]
    beta = p_ref[2:3, :]

    y = jnp.maximum(acc + bias, 0.0)                     # conv bias + ReLU
    inv_n = 1.0 / N
    # Padded lanes (cols >= N) are exactly zero (zero weight cols + zero bias), so the plain
    # sum equals the sum over the real N channels.
    mean = jnp.sum(y, axis=-1, keepdims=True) * inv_n
    centered = y - mean
    if Np != N:
        col = jax.lax.broadcasted_iota(jnp.int32, (M, Np), 1)
        cvalid = jnp.where(col < N, centered, 0.0)
    else:
        cvalid = centered
    var = jnp.sum(cvalid * cvalid, axis=-1, keepdims=True) * inv_n   # biased var (PyTorch LN)
    out = centered * jax.lax.rsqrt(var + LN_EPS) * gamma + beta
    o_ref[...] = out.astype(o_ref.dtype)


@functools.partial(jax.jit, static_argnames=("H", "W", "compute_dtype"))
def simple_patch_merging(x, w_flat, bias, gamma, beta, *, H, W,
                         compute_dtype=None):
    """x: (B, H*W, C) -> (B, ceil(H/2)*ceil(W/2), 2*C)."""
    B, L, C = x.shape
    assert L == H * W, "input feature has wrong size"
    N = 2 * C
    K = 9 * C
    Np = ((N + 127) // 128) * 128          # lane-dense stores / unmasked MXU N dimension
    Ho = (H + 1) // 2
    Wo = (W + 1) // 2
    Wo_p = ((Wo + 7) // 8) * 8             # keeps (T, Wo, C) -> (T*Wo, C) layout-preserving
    Wc = Wo_p + 1

    # ~512 output pixels per grid step, shrunk if the working set would stress VMEM
    # (v7x: 64 MiB physical / 32 MiB scoped default).
    T = max(1, min(Ho, -(-512 // Wo_p)))

    def _vmem_est(t):
        main = 2 * t * 2 * Wc * C * 4 * 2       # two phase inputs, double-buffered
        halo = 2 * 1 * Wc * C * 4 * 2
        wgt = K * Np * 4 * 2
        par = 8 * Np * 4 * 2
        outb = t * Wo_p * Np * 4 * 2
        accb = t * Wo_p * Np * 4 * 3            # accumulator + elementwise temporaries
        return main + halo + wgt + par + outb + accb

    while T > 1 and _vmem_est(T) > 24 * 1024 * 1024:
        T = max(1, T // 2)

    Ho_p = -(-Ho // T) * T
    nHB = Ho_p // T
    MT = T * Wo_p

    # Zero-pad (conv padding=1 + tile-alignment) and split the W axis into even/odd phases so
    # that every stride-2 conv tap becomes a unit-stride slice inside the kernel:
    #   x_we[b, i, ph, j, c] == x_pad[b, 2*i + ph, 2*j + 0, c]
    #   x_wo[b, i, ph, j, c] == x_pad[b, 2*i + ph, 2*j + 1, c]
    Hp = 2 * Ho_p + 2
    Wp = 2 * Wc
    x_nhwc = x.reshape(B, H, W, C)
    x_pad = jnp.pad(x_nhwc, ((0, 0), (1, Hp - H - 1), (1, Wp - W - 1), (0, 0)))
    xr = x_pad.reshape(B, Ho_p + 1, 2, Wc, 2, C)
    x_we = xr[:, :, :, :, 0, :]
    x_wo = xr[:, :, :, :, 1, :]

    w_p = jnp.zeros((K, Np), w_flat.dtype).at[:, :N].set(w_flat)
    params = (jnp.zeros((8, Np), jnp.float32)
              .at[0, :N].set(bias.astype(jnp.float32))
              .at[1, :N].set(gamma.astype(jnp.float32))
              .at[2, :N].set(beta.astype(jnp.float32)))

    if compute_dtype is not None:   # optional bf16 feed; accumulation + LayerNorm stay f32
        x_we = x_we.astype(compute_dtype)
        x_wo = x_wo.astype(compute_dtype)
        w_p = w_p.astype(compute_dtype)

    main_spec = pl.BlockSpec((1, T, 2, Wc, C), lambda b, hb: (b, hb, 0, 0, 0))
    halo_spec = pl.BlockSpec((1, 1, 1, Wc, C),
                             lambda b, hb: (b, T * (hb + 1), 0, 0, 0))

    kernel = functools.partial(_patch_merge_kernel, C=C, N=N, T=T, Wo=Wo_p)

    out = pl.pallas_call(
        kernel,
        out_shape=jax.ShapeDtypeStruct((B * Ho_p * Wo_p, Np), x.dtype),
        grid_spec=pltpu.PrefetchScalarGridSpec(
            num_scalar_prefetch=0,
            grid=(B, nHB),
            in_specs=[
                main_spec,                                   # x_we main rows
                halo_spec,                                   # x_we halo row
                main_spec,                                   # x_wo main rows
                halo_spec,                                   # x_wo halo row
                pl.BlockSpec((K, Np), lambda b, hb: (0, 0)),  # conv weight (resident)
                pl.BlockSpec((8, Np), lambda b, hb: (0, 0)),  # bias/gamma/beta block
            ],
            out_specs=pl.BlockSpec((MT, Np), lambda b, hb: (b * nHB + hb, 0)),
        ),
        compiler_params=pltpu.CompilerParams(
            dimension_semantics=("parallel", "parallel"),
            vmem_limit_bytes=64 * 1024 * 1024,
        ),
    )(x_we, x_we, x_wo, x_wo, w_p, params)

    out = out.reshape(B, Ho_p, Wo_p, Np)[:, :Ho, :Wo, :N]
    return out.reshape(B, Ho * Wo, N)


def _reference(x, w_flat, bias, gamma, beta, H, W):
    """Pure-JAX reference of the PyTorch forward (for the self-check)."""
    B, L, C = x.shape
    N = 2 * C
    Ho, Wo = (H + 1) // 2, (W + 1) // 2
    xp = jnp.pad(x.reshape(B, H, W, C), ((0, 0), (1, 1), (1, 1), (0, 0)))
    taps = [xp[:, kh:kh + 2 * Ho:2, kw:kw + 2 * Wo:2, :]
            for kh in range(3) for kw in range(3)]
    patches = jnp.stack(taps, axis=3).reshape(B, Ho, Wo, 9 * C)
    y = jnp.einsum("bhwk,kn->bhwn", patches, w_flat,
                   precision=jax.lax.Precision.HIGHEST) + bias
    y = jnp.maximum(y, 0.0)
    mean = jnp.mean(y, axis=-1, keepdims=True)
    var = jnp.mean((y - mean) ** 2, axis=-1, keepdims=True)
    y = (y - mean) * jax.lax.rsqrt(var + LN_EPS) * gamma + beta
    return y.reshape(B, Ho * Wo, N)


if __name__ == "__main__":
    # Small shapes consistent with the module: B=2, dim=C=4, H=W=16 (L=256).
    B, C, H, W = 2, 4, 16, 16
    N, K = 2 * C, 9 * C

    key = jax.random.PRNGKey(0)
    kx, kw, kb = jax.random.split(key, 3)

    x = jax.random.normal(kx, (B, H * W, C), dtype=jnp.float32)
    # Synthetic parameters (shapes match nn.Conv2d(C, 2C, 3) flattened + nn.LayerNorm(2C)).
    w_flat = jax.random.normal(kw, (K, N), dtype=jnp.float32) * 0.1
    bias = jax.random.normal(kb, (N,), dtype=jnp.float32) * 0.1
    gamma = jnp.ones((N,), dtype=jnp.float32)   # LayerNorm default init
    beta = jnp.zeros((N,), dtype=jnp.float32)

    out = simple_patch_merging(x, w_flat, bias, gamma, beta, H=H, W=W)
    jax.block_until_ready(out)

    assert out.shape == (B, (H // 2) * (W // 2), N), out.shape
    ref = _reference(x, w_flat, bias, gamma, beta, H, W)
    err = float(jnp.max(jnp.abs(out - ref)))
    assert err < 2e-3, f"kernel/reference mismatch: max abs err = {err}"
    print("KERNEL_OK")
</pallas_src>

<mosaic_0001>
module attributes {stable_mosaic.version = 11 : i64} {
  func.func @_patch_merge_kernel(%arg0: i32, %arg1: i32, %arg2: memref<1x8x2x9x4xf32, #tpu.memory_space<vmem>>, %arg3: memref<1x1x1x9x4xf32, #tpu.memory_space<vmem>>, %arg4: memref<1x8x2x9x4xf32, #tpu.memory_space<vmem>>, %arg5: memref<1x1x1x9x4xf32, #tpu.memory_space<vmem>>, %arg6: memref<36x128xf32, #tpu.memory_space<vmem>>, %arg7: memref<8x128xf32, #tpu.memory_space<vmem>>, %arg8: memref<64x128xf32, #tpu.memory_space<vmem>>) attributes {dimension_semantics = [#tpu.dimension_semantics<parallel>, #tpu.dimension_semantics<parallel>], iteration_bounds = array<i64: 2, 1>, scalar_prefetch = 0 : i64, scratch_operands = 0 : i64, tpu.core_type = #tpu.core_type<tc>, window_params = [{transform_indices = @transform_0, window_bounds = array<i64: 1, 8, 2, 9, 4>}, {transform_indices = @transform_1, window_bounds = array<i64: 1, 1, 1, 9, 4>}, {transform_indices = @transform_2, window_bounds = array<i64: 1, 8, 2, 9, 4>}, {transform_indices = @transform_3, window_bounds = array<i64: 1, 1, 1, 9, 4>}, {pipeline_mode = #tpu.pipeline_mode<synchronous>, transform_indices = @transform_4, window_bounds = array<i64: 36, 128>}, {pipeline_mode = #tpu.pipeline_mode<synchronous>, transform_indices = @transform_5, window_bounds = array<i64: 8, 128>}, {transform_indices = @transform_6, window_bounds = array<i64: 64, 128>}]} {
    %cst = arith.constant 0.000000e+00 : f32
    %0 = vector.broadcast %cst : f32 to vector<64x128xf32>
    %c0 = arith.constant 0 : index
    %c0_0 = arith.constant 0 : index
    %c0_1 = arith.constant 0 : index
    %c0_2 = arith.constant 0 : index
    %c0_3 = arith.constant 0 : index
    %1 = vector.load %arg2[%c0, %c0_0, %c0_1, %c0_2, %c0_3] : memref<1x8x2x9x4xf32, #tpu.memory_space<vmem>>, vector<1x8x1x8x4xf32>
    %2 = vector.shape_cast %1 : vector<1x8x1x8x4xf32> to vector<8x8x4xf32>
    %3 = vector.shape_cast %2 : vector<8x8x4xf32> to vector<64x4xf32>
    %c0_4 = arith.constant 0 : index
    %c0_5 = arith.constant 0 : index
    %4 = vector.load %arg6[%c0_4, %c0_5] : memref<36x128xf32, #tpu.memory_space<vmem>>, vector<4x128xf32>
    %cst_6 = arith.constant dense<0.000000e+00> : vector<64x128xf32>
    %5 = tpu.matmul %3, %4, %cst_6 {dimension_numbers = #tpu.dot_dimension_numbers<[1], [0], [0], [1], [0, 0, 1, 1], [], []>} : vector<64x4xf32>, vector<4x128xf32>, vector<64x128xf32> -> vector<64x128xf32>
    %6 = arith.addf %0, %5 : vector<64x128xf32>
    %c0_7 = arith.constant 0 : index
    %c0_8 = arith.constant 0 : index
    %c0_9 = arith.constant 0 : index
    %c0_10 = arith.constant 0 : index
    %c0_11 = arith.constant 0 : index
    %7 = vector.load %arg4[%c0_7, %c0_8, %c0_9, %c0_10, %c0_11] : memref<1x8x2x9x4xf32, #tpu.memory_space<vmem>>, vector<1x8x1x8x4xf32>
    %8 = vector.shape_cast %7 : vector<1x8x1x8x4xf32> to vector<8x8x4xf32>
    %9 = vector.shape_cast %8 : vector<8x8x4xf32> to vector<64x4xf32>
    %c4 = arith.constant 4 : index
    %c0_12 = arith.constant 0 : index
    %10 = vector.load %arg6[%c4, %c0_12] : memref<36x128xf32, #tpu.memory_space<vmem>>, vector<4x128xf32>
    %cst_13 = arith.constant dense<0.000000e+00> : vector<64x128xf32>
    %11 = tpu.matmul %9, %10, %cst_13 {dimension_numbers = #tpu.dot_dimension_numbers<[1], [0], [0], [1], [0, 0, 1, 1], [], []>} : vector<64x4xf32>, vector<4x128xf32>, vector<64x128xf32> -> vector<64x128xf32>
    %12 = arith.addf %6, %11 : vector<64x128xf32>
    %c0_14 = arith.constant 0 : index
    %c0_15 = arith.constant 0 : index
    %c0_16 = arith.constant 0 : index
    %c1 = arith.constant 1 : index
    %c0_17 = arith.constant 0 : index
    %13 = vector.load %arg2[%c0_14, %c0_15, %c0_16, %c1, %c0_17] : memref<1x8x2x9x4xf32, #tpu.memory_space<vmem>>, vector<1x8x1x8x4xf32>
    %14 = vector.shape_cast %13 : vector<1x8x1x8x4xf32> to vector<8x8x4xf32>
    %15 = vector.shape_cast %14 : vector<8x8x4xf32> to vector<64x4xf32>
    %c8 = arith.constant 8 : index
    %c0_18 = arith.constant 0 : index
    %16 = vector.load %arg6[%c8, %c0_18] : memref<36x128xf32, #tpu.memory_space<vmem>>, vector<4x128xf32>
    %cst_19 = arith.constant dense<0.000000e+00> : vector<64x128xf32>
    %17 = tpu.matmul %15, %16, %cst_19 {dimension_numbers = #tpu.dot_dimension_numbers<[1], [0], [0], [1], [0, 0, 1, 1], [], []>} : vector<64x4xf32>, vector<4x128xf32>, vector<64x128xf32> -> vector<64x128xf32>
    %18 = arith.addf %12, %17 : vector<64x128xf32>
    %c0_20 = arith.constant 0 : index
    %c0_21 = arith.constant 0 : index
    %c1_22 = arith.constant 1 : index
    %c0_23 = arith.constant 0 : index
    %c0_24 = arith.constant 0 : index
    %19 = vector.load %arg2[%c0_20, %c0_21, %c1_22, %c0_23, %c0_24] : memref<1x8x2x9x4xf32, #tpu.memory_space<vmem>>, vector<1x8x1x8x4xf32>
    %20 = vector.shape_cast %19 : vector<1x8x1x8x4xf32> to vector<8x8x4xf32>
    %21 = vector.shape_cast %20 : vector<8x8x4xf32> to vector<64x4xf32>
    %c12 = arith.constant 12 : index
    %c0_25 = arith.constant 0 : index
    %22 = vector.load %arg6[%c12, %c0_25] : memref<36x128xf32, #tpu.memory_space<vmem>>, vector<4x128xf32>
    %cst_26 = arith.constant dense<0.000000e+00> : vector<64x128xf32>
    %23 = tpu.matmul %21, %22, %cst_26 {dimension_numbers = #tpu.dot_dimension_numbers<[1], [0], [0], [1], [0, 0, 1, 1], [], []>} : vector<64x4xf32>, vector<4x128xf32>, vector<64x128xf32> -> vector<64x128xf32>
    %24 = arith.addf %18, %23 : vector<64x128xf32>
    %c0_27 = arith.constant 0 : index
    %c0_28 = arith.constant 0 : index
    %c1_29 = arith.constant 1 : index
    %c0_30 = arith.constant 0 : index
    %c0_31 = arith.constant 0 : index
    %25 = vector.load %arg4[%c0_27, %c0_28, %c1_29, %c0_30, %c0_31] : memref<1x8x2x9x4xf32, #tpu.memory_space<vmem>>, vector<1x8x1x8x4xf32>
    %26 = vector.shape_cast %25 : vector<1x8x1x8x4xf32> to vector<8x8x4xf32>
    %27 = vector.shape_cast %26 : vector<8x8x4xf32> to vector<64x4xf32>
    %c16 = arith.constant 16 : index
    %c0_32 = arith.constant 0 : index
    %28 = vector.load %arg6[%c16, %c0_32] : memref<36x128xf32, #tpu.memory_space<vmem>>, vector<4x128xf32>
    %cst_33 = arith.constant dense<0.000000e+00> : vector<64x128xf32>
    %29 = tpu.matmul %27, %28, %cst_33 {dimension_numbers = #tpu.dot_dimension_numbers<[1], [0], [0], [1], [0, 0, 1, 1], [], []>} : vector<64x4xf32>, vector<4x128xf32>, vector<64x128xf32> -> vector<64x128xf32>
    %30 = arith.addf %24, %29 : vector<64x128xf32>
    %c0_34 = arith.constant 0 : index
    %c0_35 = arith.constant 0 : index
    %c1_36 = arith.constant 1 : index
    %c1_37 = arith.constant 1 : index
    %c0_38 = arith.constant 0 : index
    %31 = vector.load %arg2[%c0_34, %c0_35, %c1_36, %c1_37, %c0_38] : memref<1x8x2x9x4xf32, #tpu.memory_space<vmem>>, vector<1x8x1x8x4xf32>
    %32 = vector.shape_cast %31 : vector<1x8x1x8x4xf32> to vector<8x8x4xf32>
    %33 = vector.shape_cast %32 : vector<8x8x4xf32> to vector<64x4xf32>
    %c20 = arith.constant 20 : index
    %c0_39 = arith.constant 0 : index
    %34 = vector.load %arg6[%c20, %c0_39] : memref<36x128xf32, #tpu.memory_space<vmem>>, vector<4x128xf32>
    %cst_40 = arith.constant dense<0.000000e+00> : vector<64x128xf32>
    %35 = tpu.matmul %33, %34, %cst_40 {dimension_numbers = #tpu.dot_dimension_numbers<[1], [0], [0], [1], [0, 0, 1, 1], [], []>} : vector<64x4xf32>, vector<4x128xf32>, vector<64x128xf32> -> vector<64x128xf32>
    %36 = arith.addf %30, %35 : vector<64x128xf32>
    %c0_41 = arith.constant 0 : index
    %c0_42 = arith.constant 0 : index
    %c0_43 = arith.constant 0 : index
    %c0_44 = arith.constant 0 : index
    %c0_45 = arith.constant 0 : index
    %37 = vector.load %arg3[%c0_41, %c0_42, %c0_43, %c0_44, %c0_45] : memref<1x1x1x9x4xf32, #tpu.memory_space<vmem>>, vector<1x1x1x8x4xf32>
    %38 = vector.shape_cast %37 : vector<1x1x1x8x4xf32> to vector<8x4xf32>
    %39 = vector.shape_cast %38 : vector<8x4xf32> to vector<1x8x4xf32>
    %c0_46 = arith.constant 0 : index
    %c1_47 = arith.constant 1 : index
    %c0_48 = arith.constant 0 : index
    %c0_49 = arith.constant 0 : index
    %c0_50 = arith.constant 0 : index
    %40 = vector.load %arg2[%c0_46, %c1_47, %c0_48, %c0_49, %c0_50] : memref<1x8x2x9x4xf32, #tpu.memory_space<vmem>>, vector<1x7x1x8x4xf32>
    %41 = vector.shape_cast %40 : vector<1x7x1x8x4xf32> to vector<7x8x4xf32>
    %42 = tpu.concatenate %41, %39 in 0 : vector<7x8x4xf32>, vector<1x8x4xf32> -> vector<8x8x4xf32>
    %43 = vector.shape_cast %42 : vector<8x8x4xf32> to vector<64x4xf32>
    %c24 = arith.constant 24 : index
    %c0_51 = arith.constant 0 : index
    %44 = vector.load %arg6[%c24, %c0_51] : memref<36x128xf32, #tpu.memory_space<vmem>>, vector<4x128xf32>
    %cst_52 = arith.constant dense<0.000000e+00> : vector<64x128xf32>
    %45 = tpu.matmul %43, %44, %cst_52 {dimension_numbers = #tpu.dot_dimension_numbers<[1], [0], [0], [1], [0, 0, 1, 1], [], []>} : vector<64x4xf32>, vector<4x128xf32>, vector<64x128xf32> -> vector<64x128xf32>
    %46 = arith.addf %36, %45 : vector<64x128xf32>
    %c0_53 = arith.constant 0 : index
    %c0_54 = arith.constant 0 : index
    %c0_55 = arith.constant 0 : index
    %c0_56 = arith.constant 0 : index
    %c0_57 = arith.constant 0 : index
    %47 = vector.load %arg5[%c0_53, %c0_54, %c0_55, %c0_56, %c0_57] : memref<1x1x1x9x4xf32, #tpu.memory_space<vmem>>, vector<1x1x1x8x4xf32>
    %48 = vector.shape_cast %47 : vector<1x1x1x8x4xf32> to vector<8x4xf32>
    %49 = vector.shape_cast %48 : vector<8x4xf32> to vector<1x8x4xf32>
    %c0_58 = arith.constant 0 : index
    %c1_59 = arith.constant 1 : index
    %c0_60 = arith.constant 0 : index
    %c0_61 = arith.constant 0 : index
    %c0_62 = arith.constant 0 : index
    %50 = vector.load %arg4[%c0_58, %c1_59, %c0_60, %c0_61, %c0_62] : memref<1x8x2x9x4xf32, #tpu.memory_space<vmem>>, vector<1x7x1x8x4xf32>
    %51 = vector.shape_cast %50 : vector<1x7x1x8x4xf32> to vector<7x8x4xf32>
    %52 = tpu.concatenate %51, %49 in 0 : vector<7x8x4xf32>, vector<1x8x4xf32> -> vector<8x8x4xf32>
    %53 = vector.shape_cast %52 : vector<8x8x4xf32> to vector<64x4xf32>
    %c28 = arith.constant 28 : index
    %c0_63 = arith.constant 0 : index
    %54 = vector.load %arg6[%c28, %c0_63] : memref<36x128xf32, #tpu.memory_space<vmem>>, vector<4x128xf32>
    %cst_64 = arith.constant dense<0.000000e+00> : vector<64x128xf32>
    %55 = tpu.matmul %53, %54, %cst_64 {dimension_numbers = #tpu.dot_dimension_numbers<[1], [0], [0], [1], [0, 0, 1, 1], [], []>} : vector<64x4xf32>, vector<4x128xf32>, vector<64x128xf32> -> vector<64x128xf32>
    %56 = arith.addf %46, %55 : vector<64x128xf32>
    %c0_65 = arith.constant 0 : index
    %c0_66 = arith.constant 0 : index
    %c0_67 = arith.constant 0 : index
    %c1_68 = arith.constant 1 : index
    %c0_69 = arith.constant 0 : index
    %57 = vector.load %arg3[%c0_65, %c0_66, %c0_67, %c1_68, %c0_69] : memref<1x1x1x9x4xf32, #tpu.memory_space<vmem>>, vector<1x1x1x8x4xf32>
    %58 = vector.shape_cast %57 : vector<1x1x1x8x4xf32> to vector<8x4xf32>
    %59 = vector.shape_cast %58 : vector<8x4xf32> to vector<1x8x4xf32>
    %c0_70 = arith.constant 0 : index
    %c1_71 = arith.constant 1 : index
    %c0_72 = arith.constant 0 : index
    %c1_73 = arith.constant 1 : index
    %c0_74 = arith.constant 0 : index
    %60 = vector.load %arg2[%c0_70, %c1_71, %c0_72, %c1_73, %c0_74] : memref<1x8x2x9x4xf32, #tpu.memory_space<vmem>>, vector<1x7x1x8x4xf32>
    %61 = vector.shape_cast %60 : vector<1x7x1x8x4xf32> to vector<7x8x4xf32>
    %62 = tpu.concatenate %61, %59 in 0 : vector<7x8x4xf32>, vector<1x8x4xf32> -> vector<8x8x4xf32>
    %63 = vector.shape_cast %62 : vector<8x8x4xf32> to vector<64x4xf32>
    %c32 = arith.constant 32 : index
    %c0_75 = arith.constant 0 : index
    %64 = vector.load %arg6[%c32, %c0_75] : memref<36x128xf32, #tpu.memory_space<vmem>>, vector<4x128xf32>
    %cst_76 = arith.constant dense<0.000000e+00> : vector<64x128xf32>
    %65 = tpu.matmul %63, %64, %cst_76 {dimension_numbers = #tpu.dot_dimension_numbers<[1], [0], [0], [1], [0, 0, 1, 1], [], []>} : vector<64x4xf32>, vector<4x128xf32>, vector<64x128xf32> -> vector<64x128xf32>
    %66 = arith.addf %56, %65 : vector<64x128xf32>
    %c0_77 = arith.constant 0 : index
    %c0_78 = arith.constant 0 : index
    %67 = vector.load %arg7[%c0_77, %c0_78] : memref<8x128xf32, #tpu.memory_space<vmem>>, vector<1x128xf32>
    %c1_79 = arith.constant 1 : index
    %c0_80 = arith.constant 0 : index
    %68 = vector.load %arg7[%c1_79, %c0_80] : memref<8x128xf32, #tpu.memory_space<vmem>>, vector<1x128xf32>
    %c2 = arith.constant 2 : index
    %c0_81 = arith.constant 0 : index
    %69 = vector.load %arg7[%c2, %c0_81] : memref<8x128xf32, #tpu.memory_space<vmem>>, vector<1x128xf32>
    %70 = vector.broadcast %67 : vector<1x128xf32> to vector<64x128xf32>
    %71 = arith.addf %66, %70 : vector<64x128xf32>
    %cst_82 = arith.constant 0.000000e+00 : f32
    %72 = vector.broadcast %cst_82 : f32 to vector<64x128xf32>
    %73 = arith.maximumf %71, %72 : vector<64x128xf32>
    %cst_83 = arith.constant dense<0.000000e+00> : vector<64xf32>
    %74 = vector.multi_reduction <add>, %73, %cst_83 [1] : vector<64x128xf32> to vector<64xf32>
    %75 = vector.shape_cast %74 : vector<64xf32> to vector<64x1xf32>
    %cst_84 = arith.constant 1.250000e-01 : f32
    %76 = vector.broadcast %cst_84 : f32 to vector<64x1xf32>
    %77 = arith.mulf %75, %76 : vector<64x1xf32>
    %78 = vector.broadcast %77 : vector<64x1xf32> to vector<64x128xf32>
    %79 = arith.subf %73, %78 : vector<64x128xf32>
    %80 = tpu.iota {dimensions = array<i32: 1>} : vector<64x128xi32>
    %c8_i32 = arith.constant 8 : i32
    %81 = vector.broadcast %c8_i32 : i32 to vector<64x128xi32>
    %82 = arith.cmpi slt, %80, %81 : vector<64x128xi32>
    %cst_85 = arith.constant 0.000000e+00 : f32
    %83 = vector.broadcast %cst_85 : f32 to vector<64x128xf32>
    %84 = arith.select %82, %79, %83 : vector<64x128xi1>, vector<64x128xf32>
    %85 = arith.mulf %84, %84 : vector<64x128xf32>
    %cst_86 = arith.constant dense<0.000000e+00> : vector<64xf32>
    %86 = vector.multi_reduction <add>, %85, %cst_86 [1] : vector<64x128xf32> to vector<64xf32>
    %87 = vector.shape_cast %86 : vector<64xf32> to vector<64x1xf32>
    %cst_87 = arith.constant 1.250000e-01 : f32
    %88 = vector.broadcast %cst_87 : f32 to vector<64x1xf32>
    %89 = arith.mulf %87, %88 : vector<64x1xf32>
    %cst_88 = arith.constant 9.99999974E-6 : f32
    %90 = vector.broadcast %cst_88 : f32 to vector<64x1xf32>
    %91 = arith.addf %89, %90 : vector<64x1xf32>
    %92 = math.rsqrt %91 : vector<64x1xf32>
    %93 = vector.broadcast %92 : vector<64x1xf32> to vector<64x128xf32>
    %94 = arith.mulf %79, %93 : vector<64x128xf32>
    %95 = vector.broadcast %68 : vector<1x128xf32> to vector<64x128xf32>
    %96 = arith.mulf %94, %95 : vector<64x128xf32>
    %97 = vector.broadcast %69 : vector<1x128xf32> to vector<64x128xf32>
    %98 = arith.addf %96, %97 : vector<64x128xf32>
    %c0_89 = arith.constant 0 : index
    %c0_90 = arith.constant 0 : index
    %99 = vector.load %arg8[%c0_89, %c0_90] : memref<64x128xf32, #tpu.memory_space<vmem>>, vector<64x128xf32>
    tpu.vector_store %arg8[%c0_89, %c0_90], %98 {strides = array<i32>} : memref<64x128xf32, #tpu.memory_space<vmem>>, vector<64x128xf32>,
    return
  }
  func.func @transform_0(%arg0: i32, %arg1: i32) -> (i32, i32, i32, i32, i32) {
    %c0_i32 = arith.constant 0 : i32
    %c0_i32_0 = arith.constant 0 : i32
    %c0_i32_1 = arith.constant 0 : i32
    %c0_i32_2 = arith.constant 0 : i32
    return %arg0, %arg1, %c0_i32, %c0_i32_0, %c0_i32_1 : i32, i32, i32, i32, i32
  }
  func.func @transform_1(%arg0: i32, %arg1: i32) -> (i32, i32, i32, i32, i32) {
    %c1_i32 = arith.constant 1 : i32
    %0 = arith.addi %arg1, %c1_i32 : i32
    %c8_i32 = arith.constant 8 : i32
    %1 = arith.muli %c8_i32, %0 : i32
    %c0_i32 = arith.constant 0 : i32
    %c0_i32_0 = arith.constant 0 : i32
    %c0_i32_1 = arith.constant 0 : i32
    %c0_i32_2 = arith.constant 0 : i32
    return %arg0, %1, %c0_i32, %c0_i32_0, %c0_i32_1 : i32, i32, i32, i32, i32
  }
  func.func @transform_2(%arg0: i32, %arg1: i32) -> (i32, i32, i32, i32, i32) {
    %c0_i32 = arith.constant 0 : i32
    %c0_i32_0 = arith.constant 0 : i32
    %c0_i32_1 = arith.constant 0 : i32
    %c0_i32_2 = arith.constant 0 : i32
    return %arg0, %arg1, %c0_i32, %c0_i32_0, %c0_i32_1 : i32, i32, i32, i32, i32
  }
  func.func @transform_3(%arg0: i32, %arg1: i32) -> (i32, i32, i32, i32, i32) {
    %c1_i32 = arith.constant 1 : i32
    %0 = arith.addi %arg1, %c1_i32 : i32
    %c8_i32 = arith.constant 8 : i32
    %1 = arith.muli %c8_i32, %0 : i32
    %c0_i32 = arith.constant 0 : i32
    %c0_i32_0 = arith.constant 0 : i32
    %c0_i32_1 = arith.constant 0 : i32
    %c0_i32_2 = arith.constant 0 : i32
    return %arg0, %1, %c0_i32, %c0_i32_0, %c0_i32_1 : i32, i32, i32, i32, i32
  }
  func.func @transform_4(%arg0: i32, %arg1: i32) -> (i32, i32) {
    %c0_i32 = arith.constant 0 : i32
    %c0_i32_0 = arith.constant 0 : i32
    %c0_i32_1 = arith.constant 0 : i32
    return %c0_i32, %c0_i32_0 : i32, i32
  }
  func.func @transform_5(%arg0: i32, %arg1: i32) -> (i32, i32) {
    %c0_i32 = arith.constant 0 : i32
    %c0_i32_0 = arith.constant 0 : i32
    %c0_i32_1 = arith.constant 0 : i32
    return %c0_i32, %c0_i32_0 : i32, i32
  }
  func.func @transform_6(%arg0: i32, %arg1: i32) -> (i32, i32) {
    %c1_i32 = arith.constant 1 : i32
    %0 = arith.muli %arg0, %c1_i32 : i32
    %1 = arith.addi %0, %arg1 : i32
    %c0_i32 = arith.constant 0 : i32
    %c0_i32_0 = arith.constant 0 : i32
    return %1, %c0_i32 : i32, i32
  }
}

</mosaic_0001>

<bundles_post_ra>
// kernel: simple_patch_merging.1
= control target key start
LH: loop header
LB: loop body
LE: loop exit
PB: predicated region body
PF: predicated region fallthrough
CT: control target
= control target key end

     0   :  { %s1847_s21 = smov 0   ;;  %s1849_s22 = smov 0   ;;  %s2280_s0 = inlined_call_operand.vmem [shape: f32[2,9,2,9,4], index: 0, kind: input, shape index: {}, may-alias: {0,1}]   ;;  %s2281_s1 = inlined_call_operand.vmem [shape: f32[2,9,2,9,4], index: 1, kind: input, shape index: {}, may-alias: {0,1}]   ;;  %s2282_s2 = inlined_call_operand.vmem [shape: f32[2,9,2,9,4], index: 2, kind: input, shape index: {}, may-alias: {2,3}]   ;;  %s2283_s3 = inlined_call_operand.vmem [shape: f32[2,9,2,9,4], index: 3, kind: input, shape index: {}, may-alias: {2,3}]   ;;  %s2284_s4 = inlined_call_operand.vmem [shape: f32[36,128], index: 4, kind: input, shape index: {}]   ;;  %s2285_s5 = inlined_call_operand.vmem [shape: f32[8,128], index: 5, kind: input, shape index: {}]   ;;  %s2286_s6 = inlined_call_operand.vmem [shape: f32[128,128], index: 6, kind: output, shape index: {}]  }
   0x1   :  { %s1851_s23 = smov 0  }
   0x2 LB: > { %s28_s24 = sadd.s32 1, %s1806_s22  ;;  %p1600_p0 = scmp.ge.s32.totalorder %s1810_s23, 1  ;;  %s1810_s23 = sphi %s1851_s23, %s16_s23   ;;  %s1806_s22 = sphi %s1849_s22, %s2288_s22   ;;  %s1802_s21 = sphi %s1847_s21, %s2287_s21  }
   0x3   : > { %p30_p1 = scmp.ge.s32.totalorder %s28_s24, 2  ;;  %p324_p2 = scmp.lt.s32.totalorder %s1810_s23, 3 }
   0x5   : > { %s2290_s24 = smov (%p30_p1, %s28_s24), 0  ;;  %p325_p3 = pnand %p1600_p0, %p324_p2 }
   0x6   : > { %p411_p4 = scmp.lt.s32.totalorder (!%p325_p3), %s1802_s21, 1  ;;  %s1605_s16 = sshll.u32 (!%p325_p3), %s1802_s21, 3 }
   0x7   : > { %328 = sbr.rel (%p325_p3) target bundleno = 565 (0x235), region = 44  ;;  %p478_p5 = scmp.lt.s32.totalorder (!%p325_p3), %s1605_s16, 15 }
   0xc   : > { %v501_v0 = vld [vmem:[%s2284_s4 + $0x4] sm:$0xf]  ;;  %vm527_vm0 = vcmask 1043456   ;;  %v648_v1 = vld [vmem:[%s2284_s4 + $0x8] sm:$0xf]  ;;  %s412_s9 = scalar_select %p411_p4, %s1802_s21, 1 }
   0xd   : > { %1739 = vmatpush.msk.msra.mxu1 %vm527_vm0, %v501_v0  ;;  %1740 = vmatpush.msk.msra.mxu2 %vm527_vm0, %v501_v0  ;;  %v734_v2 = vld [vmem:[%s2284_s4 + $0xc] sm:$0xf]  ;;  %v492_v3 = vld [vmem:[%s2284_s4] sm:$0xf]  ;;  %v820_v4 = vld [vmem:[%s2284_s4 + $0x10] sm:$0xf] }
   0xe   : > { %1741 = vmatpush.msk.msra.mxu3 %vm527_vm0, %v501_v0  ;;  %s1890_s12 = smul.u32 288, %s412_s9  ;;  %1607 = vmatpush.msk.msra.mxu0 %vm527_vm0, %v501_v0  ;;  %vm502_vm1 = vcmask 31744   ;;  %v991_v5 = vld [vmem:[%s2284_s4 + $0x18] sm:$0xf]  ;;  %v1077_v6 = vld [vmem:[%s2284_s4 + $0x1c] sm:$0xf] }
   0xf   : > { %1625 = vmatpush.msk.msrb.mxu2 %vm527_vm0, %v648_v1  ;;  %1616 = vmatpush.msk.msrb.mxu1 %vm527_vm0, %v492_v3  ;;  %v905_v11 = vld [vmem:[%s2284_s4 + $0x14] sm:$0xf]  ;;  %v1162_v12 = vld [vmem:[%s2284_s4 + $0x20] sm:$0xf]  ;;  %s2292_s16 = smov (!%p478_p5, %s1605_s16), 15 }
  0x10   : > { %1642 = vmatpush.msk.msrb.mxu3 %vm527_vm0, %v734_v2  ;;  %1659 = vmatpush.msk.msrb.mxu0 %vm527_vm0, %v820_v4  ;;  %s1898_s15 = scalar_lea.vmem %s2282_s2, %s1890_s12  ;;  %s1957_s30 = scalar_lea.vmem %s2280_s0, %s1890_s12 }
  0x11   : > { %v1907_v7 = vld [vmem:[%s1898_s15 + $0x40] sm:$0xff]  ;;  %v1634_v19 = vld [vmem:[%s1957_s30 + $0x10] sm:$0xff]  ;;  %s1736_s7 = sadd.s32 256, %s1890_s12  ;;  %s1606_s21 = sshll.u32 %s2292_s16, 3 }
  0x12   : > { %v1910_v8 = vld [vmem:[%s1898_s15 + $0x80] sm:$0xff]  ;;  %1610 = vmatmul.msk.f32.vlgmr.msra.gmra.mxu1 %vm502_vm1, %v1907_v7  ;;  %v1651_v20 = vld [vmem:[%s1898_s15 + $0x10] sm:$0xff]  ;;  %s437_s10 = scalar_lea.vmem %s2281_s1, %s1736_s7  ;;  %s473_s14 = scalar_lea.vmem %s2283_s3, %s1736_s7 }
  0x13   : > { %v1913_v9 = vld [vmem:[%s1898_s15 + $0xc0] sm:$0xff]  ;;  %1612 = vmatmul.msk.f32.vlgmr.msra.gmra.mxu2 %vm502_vm1, %v1910_v8  ;;  %1676 = vmatpush.msk.msra.mxu1 %vm527_vm0, %v905_v11  ;;  %v1635_v23 = vld [vmem:[%s1957_s30 + $0x30] sm:$0xff]  ;;  %s2239_s27 = scalar_lea.vmem %s2286_s6, %s1606_s21 }
  0x14   : > { %v493_v10 = vld [vmem:[%s1898_s15] sm:$0xff]  ;;  %1614 = vmatmul.msk.f32.vlgmr.msra.gmra.mxu3 %vm502_vm1, %v1913_v9  ;;  %1692 = vmatpush.msk.msra.mxu2 %vm527_vm0, %v991_v5  ;;  %v1652_v24 = vld [vmem:[%s1898_s15 + $0x30] sm:$0xff] }
  0x15   : > { %1608 = vmatmul.msk.f32.vlgmr.msra.gmra.mxu0 %vm502_vm1, %v493_v10  ;;  %1708 = vmatpush.msk.msra.mxu3 %vm527_vm0, %v1077_v6  ;;  %v1934_v13 = vld [vmem:[%s1898_s15 + $0x60] sm:$0xff]  ;;  %v1636_v27 = vld [vmem:[%s1957_s30 + $0x50] sm:$0xff] }
  0x16   : > { %1724 = vmatpush.msk.msra.mxu0 %vm527_vm0, %v1162_v12  ;;  %v1937_v14 = vld [vmem:[%s1898_s15 + $0xa0] sm:$0xff]  ;;  %v1653_v28 = vld [vmem:[%s1898_s15 + $0x50] sm:$0xff] }
  0x17   : > { %v1940_v15 = vld [vmem:[%s1898_s15 + $0xe0] sm:$0xff]  ;;  %v1637_v31 = vld [vmem:[%s1957_s30 + $0x70] sm:$0xff] }
  0x18   : > { %v1943_v16 = vld [vmem:[%s1898_s15 + $0x20] sm:$0xff]  ;;  %v1654_v32 = vld [vmem:[%s1898_s15 + $0x70] sm:$0xff] }
  0x19   : > { %v484_v17 = vld [vmem:[%s1957_s30] sm:$0xff]  ;;  %v1638_v35 = vld [vmem:[%s1957_s30 + $0x90] sm:$0xff] }
  0x1a   : > { %1611 = vmatmul.msk.f32.gmra.mxu1 %vm502_vm1, %v1934_v13  ;;  %v640_v18 = vld [vmem:[%s1957_s30 + $0x1] sm:$0xff]  ;;  %v1655_v36 = vld [vmem:[%s1898_s15 + $0x90] sm:$0xff] }
  0x1b   : > { %1613 = vmatmul.msk.f32.gmra.mxu2 %vm502_vm1, %v1937_v14  ;;  %v485_v21 = vld [vmem:[%s1957_s30 + $0x20] sm:$0xff]  ;;  %v1639_v39 = vld [vmem:[%s1957_s30 + $0xb0] sm:$0xff] }
  0x1c   : > { %1615 = vmatmul.msk.f32.gmra.mxu3 %vm502_vm1, %v1940_v15  ;;  %v641_v22 = vld [vmem:[%s1957_s30 + $0x21] sm:$0xff]  ;;  %v1656_v40 = vld [vmem:[%s1898_s15 + $0xb0] sm:$0xff] }
  0x1d   : > { %1609 = vmatmul.msk.f32.gmra.mxu0 %vm502_vm1, %v1943_v16  ;;  %v486_v25 = vld [vmem:[%s1957_s30 + $0x40] sm:$0xff]  ;;  %v1640_v43 = vld [vmem:[%s1957_s30 + $0xd0] sm:$0xff] }
  0x1e   : > { %v642_v26 = vld [vmem:[%s1957_s30 + $0x41] sm:$0xff]  ;;  %v1657_v44 = vld [vmem:[%s1898_s15 + $0xd0] sm:$0xff] }
  0x1f   : > { %v487_v29 = vld [vmem:[%s1957_s30 + $0x60] sm:$0xff]  ;;  %v1641_v47 = vld [vmem:[%s1957_s30 + $0xf0] sm:$0xff] }
  0x20   : > { %v643_v30 = vld [vmem:[%s1957_s30 + $0x61] sm:$0xff]  ;;  %v1658_v48 = vld [vmem:[%s1898_s15 + $0xf0] sm:$0xff] }
  0x21   : > { %v488_v33 = vld [vmem:[%s1957_s30 + $0x80] sm:$0xff]  ;;  %v1668_v49 = vld [vmem:[%s1957_s30 + $0x11] sm:$0xff] }
  0x22   : > { %1617 = vmatmul.msk.f32.vlgmr.msrb.gmra.mxu1 %vm502_vm1, %v484_v17  ;;  %v644_v34 = vld [vmem:[%s1957_s30 + $0x81] sm:$0xff]  ;;  %v1669_v50 = vld [vmem:[%s1957_s30 + $0x31] sm:$0xff] }
  0x23   : > { %1626 = vmatmul.msk.f32.vlgmr.msrb.gmra.mxu2 %vm502_vm1, %v640_v18  ;;  %v489_v37 = vld [vmem:[%s1957_s30 + $0xa0] sm:$0xff]  ;;  %v1670_v51 = vld [vmem:[%s1957_s30 + $0x51] sm:$0xff] }
  0x24   : > { %1643 = vmatmul.msk.f32.vlgmr.msrb.gmra.mxu3 %vm502_vm1, %v1634_v19  ;;  %v645_v38 = vld [vmem:[%s1957_s30 + $0xa1] sm:$0xff]  ;;  %v1671_v52 = vld [vmem:[%s1957_s30 + $0x71] sm:$0xff] }
  0x25   : > { %1660 = vmatmul.msk.f32.vlgmr.msrb.gmra.mxu0 %vm502_vm1, %v1651_v20  ;;  %v490_v41 = vld [vmem:[%s1957_s30 + $0xc0] sm:$0xff]  ;;  %v1672_v53 = vld [vmem:[%s1957_s30 + $0x91] sm:$0xff] }
  0x26   : > { %v646_v42 = vld [vmem:[%s1957_s30 + $0xc1] sm:$0xff]  ;;  %v1673_v54 = vld [vmem:[%s1957_s30 + $0xb1] sm:$0xff] }
  0x27   : > { %v491_v45 = vld [vmem:[%s1957_s30 + $0xe0] sm:$0xff]  ;;  %v1674_v56 = vld [vmem:[%s1957_s30 + $0xd1] sm:$0xff] }
  0x28   : > { %v647_v46 = vld [vmem:[%s1957_s30 + $0xe1] sm:$0xff]  ;;  %v1675_v61 = vld [vmem:[%s1957_s30 + $0xf1] sm:$0xff] }
  0x29   : > { %v982_v62 = vld [vmem:[%s437_s10] sm:$0xff] }
  0x2a   : > { %1618 = vmatmul.msk.f32.gmra.mxu1 %vm502_vm1, %v485_v21  ;;  %v1068_v63 = vld [vmem:[%s473_s14] sm:$0xff] }
  0x2b   : > { %1627 = vmatmul.msk.f32.gmra.mxu2 %vm502_vm1, %v641_v22  ;;  %v1154_v1 = vld [vmem:[%s437_s10 + $0x1] sm:$0xff] }
  0x2c   : > { %1644 = vmatmul.msk.f32.gmra.mxu3 %vm502_vm1, %v1635_v23 }
  0x2d   : > { %1661 = vmatmul.msk.f32.gmra.mxu0 %vm502_vm1, %v1652_v24 }
  0x32   : > { %1619 = vmatmul.msk.f32.gmra.mxu1 %vm502_vm1, %v486_v25 }
  0x33   : > { %1628 = vmatmul.msk.f32.gmra.mxu2 %vm502_vm1, %v642_v26 }
  0x34   : > { %1645 = vmatmul.msk.f32.gmra.mxu3 %vm502_vm1, %v1636_v27 }
  0x35   : > { %1662 = vmatmul.msk.f32.gmra.mxu0 %vm502_vm1, %v1653_v28 }
  0x3a   : > { %1620 = vmatmul.msk.f32.gmra.mxu1 %vm502_vm1, %v487_v29 }
  0x3b   : > { %1629 = vmatmul.msk.f32.gmra.mxu2 %vm502_vm1, %v643_v30 }
  0x3c   : > { %1646 = vmatmul.msk.f32.gmra.mxu3 %vm502_vm1, %v1637_v31 }
  0x3d   : > { %1663 = vmatmul.msk.f32.gmra.mxu0 %vm502_vm1, %v1654_v32 }
  0x42   : > { %1621 = vmatmul.msk.f32.gmra.mxu1 %vm502_vm1, %v488_v33 }
  0x43   : > { %1630 = vmatmul.msk.f32.gmra.mxu2 %vm502_vm1, %v644_v34 }
  0x44   : > { %1647 = vmatmul.msk.f32.gmra.mxu3 %vm502_vm1, %v1638_v35 }
  0x45   : > { %1664 = vmatmul.msk.f32.gmra.mxu0 %vm502_vm1, %v1655_v36 }
  0x4a   : > { %1622 = vmatmul.msk.f32.gmra.mxu1 %vm502_vm1, %v489_v37 }
  0x4b   : > { %1631 = vmatmul.msk.f32.gmra.mxu2 %vm502_vm1, %v645_v38 }
  0x4c   : > { %1648 = vmatmul.msk.f32.gmra.mxu3 %vm502_vm1, %v1639_v39 }
  0x4d   : > { %1665 = vmatmul.msk.f32.gmra.mxu0 %vm502_vm1, %v1656_v40 }
  0x52   : > { %1623 = vmatmul.msk.f32.gmra.mxu1 %vm502_vm1, %v490_v41 }
  0x53   : > { %1632 = vmatmul.msk.f32.gmra.mxu2 %vm502_vm1, %v646_v42 }
  0x54   : > { %1649 = vmatmul.msk.f32.gmra.mxu3 %vm502_vm1, %v1640_v43 }
  0x55   : > { %1666 = vmatmul.msk.f32.gmra.mxu0 %vm502_vm1, %v1657_v44 }
  0x5a   : > { %1624 = vmatmul.msk.f32.gmra.mxu1 %vm502_vm1, %v491_v45 }
  0x5b   : > { %1633 = vmatmul.msk.f32.gmra.mxu2 %vm502_vm1, %v647_v46 }
  0x5c   : > { %1650 = vmatmul.msk.f32.gmra.mxu3 %vm502_vm1, %v1641_v47 }
  0x5d   : > { %1667 = vmatmul.msk.f32.gmra.mxu0 %vm502_vm1, %v1658_v48 }
  0x62   : > { %1677 = vmatmul.msk.f32.vlgmr.msra.gmra.mxu1 %vm502_vm1, %v1668_v49 }
  0x63   : > { %1693 = vmatmul.msk.f32.vlgmr.msra.gmra.mxu2 %vm502_vm1, %v485_v21 }
  0x64   : > { %1709 = vmatmul.msk.f32.vlgmr.msra.gmra.mxu3 %vm502_vm1, %v1943_v16 }
  0x65   : > { %1725 = vmatmul.msk.f32.vlgmr.msra.gmra.mxu0 %vm502_vm1, %v641_v22 }
  0x6a   : > { %1678 = vmatmul.msk.f32.gmra.mxu1 %vm502_vm1, %v1669_v50 }
  0x6b   : > { %1694 = vmatmul.msk.f32.gmra.mxu2 %vm502_vm1, %v486_v25 }
  0x6c   : > { %1710 = vmatmul.msk.f32.gmra.mxu3 %vm502_vm1, %v1907_v7 }
  0x6d   : > { %1726 = vmatmul.msk.f32.gmra.mxu0 %vm502_vm1, %v642_v26 }
  0x72   : > { %1679 = vmatmul.msk.f32.gmra.mxu1 %vm502_vm1, %v1670_v51 }
  0x73   : > { %1695 = vmatmul.msk.f32.gmra.mxu2 %vm502_vm1, %v487_v29 }
  0x74   : > { %1711 = vmatmul.msk.f32.gmra.mxu3 %vm502_vm1, %v1934_v13 }
  0x75   : > { %1727 = vmatmul.msk.f32.gmra.mxu0 %vm502_vm1, %v643_v30 }
  0x7a   : > { %1680 = vmatmul.msk.f32.gmra.mxu1 %vm502_vm1, %v1671_v52  ;;  %v2125_v52 = vld [vmem:[%s2285_s5] ss:$0 sm:$0xff] }
  0x7b   : > { %1696 = vmatmul.msk.f32.gmra.mxu2 %vm502_vm1, %v488_v33 }
  0x7c   : > { %1712 = vmatmul.msk.f32.gmra.mxu3 %vm502_vm1, %v1910_v8 }
  0x7d   : > { %1728 = vmatmul.msk.f32.gmra.mxu0 %vm502_vm1, %v644_v34 }
  0x82   : > { %1681 = vmatmul.msk.f32.gmra.mxu1 %vm502_vm1, %v1672_v53 }
  0x83   : > { %1697 = vmatmul.msk.f32.gmra.mxu2 %vm502_vm1, %v489_v37 }
  0x84   : > { %1713 = vmatmul.msk.f32.gmra.mxu3 %vm502_vm1, %v1937_v14 }
  0x85   : > { %1729 = vmatmul.msk.f32.gmra.mxu0 %vm502_vm1, %v645_v38 }
  0x8a   : > { %1682 = vmatmul.msk.f32.gmra.mxu1 %vm502_vm1, %v1673_v54 }
  0x8b   : > { %1698 = vmatmul.msk.f32.gmra.mxu2 %vm502_vm1, %v490_v41 }
  0x8c   : > { %1714 = vmatmul.msk.f32.gmra.mxu3 %vm502_vm1, %v1913_v9 }
  0x8d   : > { %1730 = vmatmul.msk.f32.gmra.mxu0 %vm502_vm1, %v646_v42 }
  0x8f   : > { %v2059_v55 = vpop.f32.mrf.mxu1 }
  0x92   : > { %v548_v57 = vpop.f32.mrf.mxu0  ;;  %1683 = vmatmul.msk.f32.gmra.mxu1 %vm502_vm1, %v1674_v56 }
  0x93   : > { %1699 = vmatmul.msk.f32.gmra.mxu2 %vm502_vm1, %v491_v45 }
  0x94   : > { %1715 = vmatmul.msk.f32.gmra.mxu3 %vm502_vm1, %v1940_v15 }
  0x95   : > { %1731 = vmatmul.msk.f32.gmra.mxu0 %vm502_vm1, %v647_v46 }
  0x96   : > { %v2071_v58 = vpop.f32.mrf.mxu2 }
  0x97   : > { %v2076_v59 = vpop.f32.mrf.mxu3  ;;  %v2078_v60 = vpop.f32.mrf.mxu1 }
  0x9a   : > { %v551_v0 = vpop.f32.mrf.mxu0  ;;  %1684 = vmatmul.msk.f32.gmra.mxu1 %vm502_vm1, %v1675_v61 }
  0x9b   : > { %1700 = vmatmul.msk.f32.gmra.mxu2 %vm502_vm1, %v982_v62 }
  0x9c   : > { %1716 = vmatmul.msk.f32.gmra.mxu3 %vm502_vm1, %v1068_v63 }
  0x9d   : > { %1732 = vmatmul.msk.f32.gmra.mxu0 %vm502_vm1, %v1154_v1 }
  0x9e   : > { %v2085_v2 = vpop.f32.mrf.mxu2 }
  0x9f   : > { %v2087_v3 = vpop.f32.mrf.mxu3  ;;  %v616_v4 = vpop.f32.mrf.mxu1 }
  0xa0   : > { %v617_v33 = vadd.f32 %v616_v4, %v548_v57 }
  0xa2   : > { %v865_v5 = vpop.f32.mrf.mxu0 }
  0xa6   : > { %v693_v6 = vpop.f32.mrf.mxu2 }
  0xa7   : > { %v779_v7 = vpop.f32.mrf.mxu3  ;;  %v619_v8 = vpop.f32.mrf.mxu1  ;;  %v717_v35 = vadd.f32 %v693_v6, %v617_v33 }
  0xa8   : > { %v620_v40 = vadd.f32 %v619_v8, %v551_v0 }
  0xa9   : > { %v803_v37 = vadd.f32 %v779_v7, %v717_v35 }
  0xaa   : > { %v868_v9 = vpop.f32.mrf.mxu0 }
  0xab   : > { %v889_v42 = vadd.f32 %v865_v5, %v803_v37 }
  0xae   : > { %v696_v10 = vpop.f32.mrf.mxu2 }
  0xaf   : > { %v782_v11 = vpop.f32.mrf.mxu3  ;;  %v622_v12 = vpop.f32.mrf.mxu1  ;;  %v718_v43 = vadd.f32 %v696_v10, %v620_v40 }
  0xb0   : > { %v623_v50 = vadd.f32 %v622_v12, %v2059_v55 }
  0xb1   : > { %v804_v46 = vadd.f32 %v782_v11, %v718_v43 }
  0xb2   : > { %v871_v13 = vpop.f32.mrf.mxu0 }
  0xb3   : > { %v890_v54 = vadd.f32 %v868_v9, %v804_v46 }
  0xb6   : > { %v699_v14 = vpop.f32.mrf.mxu2 }
  0xb7   : > { %v785_v15 = vpop.f32.mrf.mxu3  ;;  %v625_v16 = vpop.f32.mrf.mxu1  ;;  %v719_v56 = vadd.f32 %v699_v14, %v623_v50 }
  0xb8   : > { %v626_v6 = vadd.f32 %v625_v16, %v2078_v60 }
  0xb9   : > { %v805_v0 = vadd.f32 %v785_v15, %v719_v56 }
  0xba   : > { %v2089_v17 = vpop.f32.mrf.mxu0 }
  0xbb   : > { %v891_v9 = vadd.f32 %v871_v13, %v805_v0 }
  0xbe   : > { %v702_v18 = vpop.f32.mrf.mxu2 }
  0xbf   : > { %v788_v19 = vpop.f32.mrf.mxu3  ;;  %v628_v20 = vpop.f32.mrf.mxu1  ;;  %v720_v10 = vadd.f32 %v702_v18, %v626_v6 }
  0xc0   : > { %v629_v60 = vadd.f32 %v628_v20, %v2071_v58 }
  0xc1   : > { %v806_v33 = vadd.f32 %v788_v19, %v720_v10 }
  0xc2   : > { %v2091_v21 = vpop.f32.mrf.mxu0 }
  0xc3   : > { %v892_v18 = vadd.f32 %v2089_v17, %v806_v33 }
  0xc6   : > { %v2093_v22 = vpop.f32.mrf.mxu2 }
  0xc7   : > { %v2095_v23 = vpop.f32.mrf.mxu3  ;;  %v2097_v24 = vpop.f32.mrf.mxu1 }
  0xca   : > { %v2099_v25 = vpop.f32.mrf.mxu0 }
  0xce   : > { %v2101_v26 = vpop.f32.mrf.mxu2 }
  0xcf   : > { %v2103_v27 = vpop.f32.mrf.mxu3  ;;  %v2105_v28 = vpop.f32.mrf.mxu1 }
  0xd2   : > { %v2107_v29 = vpop.f32.mrf.mxu0 }
  0xd6   : > { %v2109_v30 = vpop.f32.mrf.mxu2 }
  0xd7   : > { %v2111_v31 = vpop.f32.mrf.mxu3  ;;  %v2113_v32 = vpop.f32.mrf.mxu1 }
  0xd8   : > { %v638_v10 = vadd.f32 %v2113_v32, %v2087_v3 }
  0xda   : > { %v2115_v34 = vpop.f32.mrf.mxu0 }
  0xde   : > { %v2117_v36 = vpop.f32.mrf.mxu2 }
  0xdf   : > { %v2119_v38 = vpop.f32.mrf.mxu3  ;;  %v950_v39 = vpop.f32.mrf.mxu1 }
  0xe0   : > { %v974_v44 = vadd.f32 %v950_v39, %v889_v42 }
  0xe2   : > { %v1207_v41 = vpop.f32.mrf.mxu0 }
  0xe6   : > { %v1036_v45 = vpop.f32.mrf.mxu2 }
  0xe7   : > { %v1060_v47 = vadd.f32 %v1036_v45, %v974_v44  ;;  %v1122_v48 = vpop.f32.mrf.mxu3  ;;  %v953_v49 = vpop.f32.mrf.mxu1 }
  0xe8   : > { %v975_v61 = vadd.f32 %v953_v49, %v890_v54 }
  0xe9   : > { %v1146_v51 = vadd.f32 %v1122_v48, %v1060_v47  ;;  %v632_v48 = vadd.f32 %v2097_v24, %v2085_v2 }
  0xea   : > { %v1210_v53 = vpop.f32.mrf.mxu0 }
  0xeb   : > { %v1231_v57 = vadd.f32 %v1207_v41, %v1146_v51  ;;  %v721_v41 = vadd.f32 %v2093_v22, %v629_v60  ;;  %v722_v50 = vadd.f32 %v2101_v26, %v632_v48  ;;  %v1291_v48 = vlaneseq }
  0xed   : > { %v2128_v62 = vadd.f32 %v2125_v52, %v1231_v57  ;;  %v807_v45 = vadd.f32 %v2095_v23, %v721_v41  ;;  %v808_v56 = vadd.f32 %v2103_v27, %v722_v50 }
  0xee   : > { %v1039_v63 = vpop.f32.mrf.mxu2 }
  0xef   : > { %v1061_v1 = vadd.f32 %v1039_v63, %v975_v61  ;;  %v1125_v4 = vpop.f32.mrf.mxu3  ;;  %v1251_v55 = vmax.f32 %v2128_v62, 0.0  ;;  %v956_v5 = vpop.f32.mrf.mxu1  ;;  %v893_v22 = vadd.f32 %v2091_v21, %v807_v45  ;;  %v635_v63 = vadd.f32 %v2105_v28, %v2076_v59 }
  0xf0   : > { %v976_v12 = vadd.f32 %v956_v5, %v891_v9  ;;  %v894_v21 = vadd.f32 %v2099_v25, %v808_v56 }
  0xf1   : > { %v1147_v7 = vadd.f32 %v1125_v4, %v1061_v1  ;;  %1259 = vadd.xlane.f32.xlu0 %v1251_v55  ;;  %v723_v26 = vadd.f32 %v2109_v30, %v635_v63 }
  0xf2   : > { %v1213_v8 = vpop.f32.mrf.mxu0 }
  0xf3   : > { %v1232_v11 = vadd.f32 %v1210_v53, %v1147_v7  ;;  %v809_v7 = vadd.f32 %v2111_v31, %v723_v26 }
  0xf5   : > { %v2135_v14 = vadd.f32 %v2125_v52, %v1232_v11  ;;  %v895_v30 = vadd.f32 %v2107_v29, %v809_v7  ;;  %v724_v11 = vadd.f32 %v2117_v36, %v638_v10 }
  0xf6   : > { %v1042_v15 = vpop.f32.mrf.mxu2 }
  0xf7   : > { %v1062_v35 = vadd.f32 %v1042_v15, %v976_v12  ;;  %v1128_v37 = vpop.f32.mrf.mxu3  ;;  %v1252_v39 = vmax.f32 %v2135_v14, 0.0  ;;  %v959_v40 = vpop.f32.mrf.mxu1 }
  0xf8   : > { %v977_v43 = vadd.f32 %v959_v40, %v892_v18 }
  0xf9   : > { %v1148_v16 = vadd.f32 %v1128_v37, %v1062_v35  ;;  %1261 = vadd.xlane.f32.xlu0 %v1252_v39  ;;  %v810_v37 = vadd.f32 %v2119_v38, %v724_v11 }
  0xfa   : > { %v1216_v13 = vpop.f32.mrf.mxu0 }
  0xfb   : > { %v1233_v42 = vadd.f32 %v1213_v8, %v1148_v16 }
  0xfd   : > { %v2144_v19 = vadd.f32 %v2125_v52, %v1233_v42 }
  0xfe   : > { %v1045_v44 = vpop.f32.mrf.mxu2 }
  0xff   : > { %v1063_v46 = vadd.f32 %v1045_v44, %v977_v43  ;;  %v1131_v47 = vpop.f32.mrf.mxu3  ;;  %v1253_v58 = vmax.f32 %v2144_v19, 0.0  ;;  %v962_v20 = vpop.f32.mrf.mxu1 }
 0x100   : > { %v978_v53 = vadd.f32 %v962_v20, %v893_v22 }
 0x101   : > { %v1149_v49 = vadd.f32 %v1131_v47, %v1063_v46  ;;  %1263 = vadd.xlane.f32.xlu1 %v1253_v58 }
 0x102   : > { %v1219_v17 = vpop.f32.mrf.mxu0 }
 0x103   : > { %v1234_v51 = vadd.f32 %v1216_v13, %v1149_v49  ;;  %v896_v13 = vadd.f32 %v2115_v34, %v810_v37  ;;  %v1292_v49 = vand.u32 127, %v1291_v48 }
 0x105   : > { %v2155_v23 = vadd.f32 %v2125_v52, %v1234_v51  ;;  %vm1293_vm2 = vcmp.lt.s32.totalorder %v1292_v49, 8 }
 0x106   : > { %v1048_v54 = vpop.f32.mrf.mxu2 }
 0x107   : > { %v1064_v57 = vadd.f32 %v1048_v54, %v978_v53  ;;  %v1134_v61 = vpop.f32.mrf.mxu3  ;;  %v1254_v2 = vmax.f32 %v2155_v23, 0.0  ;;  %v965_v24 = vpop.f32.mrf.mxu1 }
 0x108   : > { %v979_v5 = vadd.f32 %v965_v24, %v894_v21 }
 0x109   : > { %v1150_v0 = vadd.f32 %v1134_v61, %v1064_v57  ;;  %1265 = vadd.xlane.f32.xlu1 %v1254_v2 }
 0x10a   : > { %v1222_v4 = vpop.f32.mrf.mxu0 }
 0x10b   : > { %v1235_v1 = vadd.f32 %v1219_v17, %v1150_v0 }
 0x10d   : > { %v2166_v27 = vadd.f32 %v2125_v52, %v1235_v1 }
 0x10e   : > { %v1051_v6 = vpop.f32.mrf.mxu2 }
 0x10f   : > { %v1065_v8 = vadd.f32 %v1051_v6, %v979_v5  ;;  %v1137_v9 = vpop.f32.mrf.mxu3  ;;  %v1255_v59 = vmax.f32 %v2166_v27, 0.0  ;;  %v968_v28 = vpop.f32.mrf.mxu1 }
 0x110   : > { %v980_v15 = vadd.f32 %v968_v28, %v895_v30 }
 0x111   : > { %v1151_v25 = vadd.f32 %v1137_v9, %v1065_v8  ;;  %1267 = vadd.xlane.f32.xlu2 %v1255_v59 }
 0x112   : > { %v1225_v35 = vpop.f32.mrf.mxu0 }
 0x113   : > { %v1236_v12 = vadd.f32 %v1222_v4, %v1151_v25 }
 0x115   : > { %v1248_v31 = vadd.f32 %v2125_v52, %v1236_v12 }
 0x116   : > { %v1054_v33 = vpop.f32.mrf.mxu2 }
 0x117   : > { %v1066_v40 = vadd.f32 %v1054_v33, %v980_v15  ;;  %v1140_v60 = vpop.f32.mrf.mxu3  ;;  %v1256_v16 = vmax.f32 %v1248_v31, 0.0  ;;  %v971_v32 = vpop.f32.mrf.mxu1 }
 0x118   : > { %v981_v29 = vadd.f32 %v971_v32, %v896_v13 }
 0x119   : > { %v1152_v3 = vadd.f32 %v1140_v60, %v1066_v40  ;;  %1269 = vadd.xlane.f32.xlu2 %v1256_v16 }
 0x11a   : > { %v1228_v45 = vpop.f32.mrf.mxu0 }
 0x11b   : > { %v1237_v18 = vadd.f32 %v1225_v35, %v1152_v3 }
 0x11d   : > { %v1249_v36 = vadd.f32 %v2125_v52, %v1237_v18 }
 0x11e   : > { %v1057_v41 = vpop.f32.mrf.mxu2 }
 0x11f   : > { %v1067_v42 = vadd.f32 %v1057_v41, %v981_v29  ;;  %v1143_v43 = vpop.f32.mrf.mxu3  ;;  %v1257_v44 = vmax.f32 %v1249_v36, 0.0 }
 0x121   : > { %v1153_v46 = vadd.f32 %v1143_v43, %v1067_v42  ;;  %1271 = vadd.xlane.f32.xlu0 %v1257_v44 }
 0x123   : > { %v1238_v38 = vadd.f32 %v1228_v45, %v1153_v46  ;;  %v2227_v45 = vld [vmem:[%s2285_s5 + $0x1] ss:$0 sm:$0xff] }
 0x125   : > { %v1250_v47 = vadd.f32 %v2125_v52, %v1238_v38 }
 0x127   : > { %v1258_v20 = vmax.f32 %v1250_v47, 0.0  ;;  %v2232_v47 = vld [vmem:[%s2285_s5 + $0x2] ss:$0 sm:$0xff] }
 0x129   : > { %1273 = vadd.xlane.f32.xlu1 %v1258_v20 }
 0x164   : > { %v1260_v17 = vpop.xlane.xlu0 %1259 }
 0x165   : > { %v1275_v34 = vmul.f32 0.125, %v1260_v17 }
 0x167   : > { %v2183_v22 = vsub.f32 %v1251_v55, %v1275_v34 }
 0x169   : > { %v1294_v50 = vsel %vm1293_vm2, %v2183_v22, 0.0 }
 0x16a   : > { %v1302_v51 = vmul.f32 %v1294_v50, %v1294_v50 }
 0x16c   : > { %1310 = vadd.xlane.f32.xlu2 %v1302_v51  ;;  %v1262_v53 = vpop.xlane.xlu0 %1261 }
 0x16d   : > { %v1276_v54 = vmul.f32 0.125, %v1262_v53 }
 0x16f   : > { %v2189_v52 = vsub.f32 %v1252_v39, %v1276_v54 }
 0x171   : > { %v1295_v56 = vsel %vm1293_vm2, %v2189_v52, 0.0 }
 0x172   : > { %v1303_v57 = vmul.f32 %v1295_v56, %v1295_v56 }
 0x174   : > { %v1264_v61 = vpop.xlane.xlu1 %1263  ;;  %1312 = vadd.xlane.f32.xlu0 %v1303_v57 }
 0x175   : > { %v1277_v62 = vmul.f32 0.125, %v1264_v61 }
 0x177   : > { %v2195_v55 = vsub.f32 %v1253_v58, %v1277_v62 }
 0x179   : > { %v1296_v24 = vsel %vm1293_vm2, %v2195_v55, 0.0 }
 0x17a   : > { %v1304_v63 = vmul.f32 %v1296_v24, %v1296_v24 }
 0x17c   : > { %1314 = vadd.xlane.f32.xlu1 %v1304_v63  ;;  %v1266_v0 = vpop.xlane.xlu1 %1265 }
 0x17d   : > { %v1278_v14 = vmul.f32 0.125, %v1266_v0 }
 0x17f   : > { %v2201_v39 = vsub.f32 %v1254_v2, %v1278_v14 }
 0x181   : > { %v1297_v21 = vsel %vm1293_vm2, %v2201_v39, 0.0 }
 0x182   : > { %v1305_v26 = vmul.f32 %v1297_v21, %v1297_v21 }
 0x184   : > { %v1268_v1 = vpop.xlane.xlu2 %1267  ;;  %1316 = vadd.xlane.f32.xlu2 %v1305_v26 }
 0x185   : > { %v1279_v19 = vmul.f32 0.125, %v1268_v1 }
 0x187   : > { %v2207_v58 = vsub.f32 %v1255_v59, %v1279_v19 }
 0x189   : > { %v1298_v4 = vsel %vm1293_vm2, %v2207_v58, 0.0 }
 0x18a   : > { %v1306_v5 = vmul.f32 %v1298_v4, %v1298_v4 }
 0x18c   : > { %v1270_v6 = vpop.xlane.xlu2 %1269  ;;  %1318 = vadd.xlane.f32.xlu0 %v1306_v5 }
 0x18d   : > { %v1280_v23 = vmul.f32 0.125, %v1270_v6 }
 0x18f   : > { %v2211_v2 = vsub.f32 %v1256_v16, %v1280_v23 }
 0x191   : > { %v1299_v7 = vsel %vm1293_vm2, %v2211_v2, 0.0 }
 0x192   : > { %v1307_v8 = vmul.f32 %v1299_v7, %v1299_v7 }
 0x194   : > { %1320 = vadd.xlane.f32.xlu1 %v1307_v8  ;;  %v1272_v9 = vpop.xlane.xlu0 %1271 }
 0x195   : > { %v1281_v28 = vmul.f32 0.125, %v1272_v9 }
 0x197   : > { %v2215_v10 = vsub.f32 %v1257_v44, %v1281_v28 }
 0x199   : > { %v1300_v27 = vsel %vm1293_vm2, %v2215_v10, 0.0 }
 0x19a   : > { %v1308_v59 = vmul.f32 %v1300_v27, %v1300_v27 }
 0x19c   : > { %v1274_v25 = vpop.xlane.xlu1 %1273  ;;  %1322 = vadd.xlane.f32.xlu2 %v1308_v59 }
 0x19d   : > { %v1282_v30 = vmul.f32 0.125, %v1274_v25 }
 0x19f   : > { %v2219_v11 = vsub.f32 %v1258_v20, %v1282_v30 }
 0x1a1   : > { %v1301_v12 = vsel %vm1293_vm2, %v2219_v11, 0.0 }
 0x1a2   : > { %v1309_v15 = vmul.f32 %v1301_v12, %v1301_v12 }
 0x1a4   : > { %1324 = vadd.xlane.f32.xlu0 %v1309_v15 }
 0x1df   : > { %v1311_v31 = vpop.xlane.xlu2 %1310 }
 0x1e0   : > { %v1326_v33 = vmul.f32 0.125, %v1311_v31 }
 0x1e2   : > { %v1334_v35 = vadd.f32 1e-05, %v1326_v33 }
 0x1e4   : > { %1772 = vrsqrt.f32 %v1334_v35  ;;  %vm1348_vm4 = vweird.f32 %v1334_v35 }
 0x1e7   : > { %v1313_v37 = vpop.xlane.xlu0 %1312 }
 0x1e8   : > { %v1327_v40 = vmul.f32 0.125, %v1313_v37 }
 0x1ea   : > { %v1773_v60 = vpop.eup %1772  ;;  %v1335_v16 = vadd.f32 1e-05, %v1327_v40 }
 0x1eb   : > { %v1343_v3 = vmul.f32 %v1773_v60, %v1334_v35  ;;  %vm1349_vm3 = vweird.f32 %v1773_v60 }
 0x1ec   : > { %1774 = vrsqrt.f32 %v1335_v16  ;;  %vm1350_vm5 = vmor %vm1348_vm4, %vm1349_vm3  ;;  %vm1358_vm7 = vweird.f32 %v1335_v16 }
 0x1ed   : > { %v1344_v32 = vmul.f32 %v1773_v60, %v1343_v3 }
 0x1ef   : > { %v1345_v13 = vmul.f32 0.5, %v1344_v32  ;;  %v1315_v18 = vpop.xlane.xlu1 %1314 }
 0x1f0   : > { %v1328_v29 = vmul.f32 0.125, %v1315_v18 }
 0x1f1   : > { %v1346_v36 = vsub.f32 1.5, %v1345_v13 }
 0x1f2   : > { %v1775_v41 = vpop.eup %1774  ;;  %v1336_v42 = vadd.f32 1e-05, %v1328_v29 }
 0x1f3   : > { %v1347_v43 = vmul.f32 %v1773_v60, %v1346_v36  ;;  %v1353_v44 = vmul.f32 %v1775_v41, %v1335_v16  ;;  %vm1359_vm6 = vweird.f32 %v1775_v41 }
 0x1f4   : > { %1776 = vrsqrt.f32 %v1336_v42  ;;  %vm1360_vm8 = vmor %vm1358_vm7, %vm1359_vm6  ;;  %vm1368_vm10 = vweird.f32 %v1336_v42 }
 0x1f5   : > { %v1351_v46 = vsel %vm1350_vm5, %v1773_v60, %v1347_v43  ;;  %v1354_v38 = vmul.f32 %v1775_v41, %v1353_v44 }
 0x1f6   : > { %v1422_v20 = vmul.f32 %v1351_v46, %v2183_v22 }
 0x1f7   : > { %v1355_v48 = vmul.f32 0.5, %v1354_v38  ;;  %v1317_v49 = vpop.xlane.xlu2 %1316 }
 0x1f8   : > { %v1431_v17 = vmul.f32 %v2227_v45, %v1422_v20  ;;  %v1329_v34 = vmul.f32 0.125, %v1317_v49 }
 0x1f9   : > { %v1356_v50 = vsub.f32 1.5, %v1355_v48 }
 0x1fa   : > { %v1777_v51 = vpop.eup %1776  ;;  %v1440_v53 = vadd.f32 %v2232_v47, %v1431_v17  ;;  %v1337_v54 = vadd.f32 1e-05, %v1329_v34 }
 0x1fb   : > { %v1357_v56 = vmul.f32 %v1775_v41, %v1356_v50  ;;  %v1363_v22 = vmul.f32 %v1777_v51, %v1336_v42  ;;  %vm1369_vm9 = vweird.f32 %v1777_v51 }
 0x1fc   : > { %1448 = vst [vmem:[%s2239_s27] sm:$0xff] %v1440_v53  ;;  %1778 = vrsqrt.f32 %v1337_v54  ;;  %vm1370_vm11 = vmor %vm1368_vm10, %vm1369_vm9  ;;  %vm1378_vm13 = vweird.f32 %v1337_v54 }
 0x1fd   : > { %v1361_v57 = vsel %vm1360_vm8, %v1775_v41, %v1357_v56  ;;  %v1364_v61 = vmul.f32 %v1777_v51, %v1363_v22 }
 0x1fe   : > { %v1423_v62 = vmul.f32 %v1361_v57, %v2189_v52 }
 0x1ff   : > { %v1365_v24 = vmul.f32 0.5, %v1364_v61  ;;  %v1319_v63 = vpop.xlane.xlu0 %1318 }
 0x200   : > { %v1432_v0 = vmul.f32 %v2227_v45, %v1423_v62  ;;  %v1330_v14 = vmul.f32 0.125, %v1319_v63 }
 0x201   : > { %v1366_v21 = vsub.f32 1.5, %v1365_v24 }
 0x202   : > { %v1779_v26 = vpop.eup %1778  ;;  %v1441_v1 = vadd.f32 %v2232_v47, %v1432_v0  ;;  %v1338_v19 = vadd.f32 1e-05, %v1330_v14 }
 0x203   : > { %v1367_v4 = vmul.f32 %v1777_v51, %v1366_v21  ;;  %v1373_v5 = vmul.f32 %v1779_v26, %v1337_v54  ;;  %vm1379_vm12 = vweird.f32 %v1779_v26 }
 0x204   : > { %1449 = vst [vmem:[%s2239_s27 + $0x8] sm:$0xff] %v1441_v1  ;;  %1780 = vrsqrt.f32 %v1338_v19  ;;  %vm1380_vm14 = vmor %vm1378_vm13, %vm1379_vm12  ;;  %vm1388_vm0 = vweird.f32 %v1338_v19 }
 0x205   : > { %v1371_v6 = vsel %vm1370_vm11, %v1777_v51, %v1367_v4  ;;  %v1374_v52 = vmul.f32 %v1779_v26, %v1373_v5 }
 0x206   : > { %v1424_v23 = vmul.f32 %v1371_v6, %v2195_v55 }
 0x207   : > { %v1375_v7 = vmul.f32 0.5, %v1374_v52  ;;  %v1321_v8 = vpop.xlane.xlu1 %1320 }
 0x208   : > { %v1433_v9 = vmul.f32 %v2227_v45, %v1424_v23  ;;  %v1331_v28 = vmul.f32 0.125, %v1321_v8 }
 0x209   : > { %v1376_v27 = vsub.f32 1.5, %v1375_v7 }
 0x20a   : > { %v1781_v59 = vpop.eup %1780  ;;  %v1442_v25 = vadd.f32 %v2232_v47, %v1433_v9  ;;  %v1339_v30 = vadd.f32 1e-05, %v1331_v28 }
 0x20b   : > { %v1377_v12 = vmul.f32 %v1779_v26, %v1376_v27  ;;  %v1383_v15 = vmul.f32 %v1781_v59, %v1338_v19  ;;  %vm1389_vm15 = vweird.f32 %v1781_v59 }
 0x20c   : > { %1450 = vst [vmem:[%s2239_s27 + $0x10] sm:$0xff] %v1442_v25  ;;  %1782 = vrsqrt.f32 %v1339_v30  ;;  %vm1390_vm1 = vmor %vm1388_vm0, %vm1389_vm15  ;;  %vm1398_vm3 = vweird.f32 %v1339_v30 }
 0x20d   : > { %v1381_v31 = vsel %vm1380_vm14, %v1779_v26, %v1377_v12  ;;  %v1384_v55 = vmul.f32 %v1781_v59, %v1383_v15 }
 0x20e   : > { %v1425_v33 = vmul.f32 %v1381_v31, %v2201_v39 }
 0x20f   : > { %v1385_v35 = vmul.f32 0.5, %v1384_v55  ;;  %v1323_v37 = vpop.xlane.xlu2 %1322 }
 0x210   : > { %v1434_v40 = vmul.f32 %v2227_v45, %v1425_v33  ;;  %v1332_v60 = vmul.f32 0.125, %v1323_v37 }
 0x211   : > { %v1386_v16 = vsub.f32 1.5, %v1385_v35 }
 0x212   : > { %v1783_v3 = vpop.eup %1782  ;;  %v1443_v32 = vadd.f32 %v2232_v47, %v1434_v40  ;;  %v1340_v13 = vadd.f32 1e-05, %v1332_v60 }
 0x213   : > { %v1387_v18 = vmul.f32 %v1781_v59, %v1386_v16  ;;  %v1393_v29 = vmul.f32 %v1783_v3, %v1339_v30  ;;  %vm1399_vm2 = vweird.f32 %v1783_v3 }
 0x214   : > { %1451 = vst [vmem:[%s2239_s27 + $0x18] sm:$0xff] %v1443_v32  ;;  %1784 = vrsqrt.f32 %v1340_v13  ;;  %vm1400_vm4 = vmor %vm1398_vm3, %vm1399_vm2  ;;  %vm1408_vm6 = vweird.f32 %v1340_v13 }
 0x215   : > { %v1391_v36 = vsel %vm1390_vm1, %v1781_v59, %v1387_v18  ;;  %v1394_v39 = vmul.f32 %v1783_v3, %v1393_v29 }
 0x216   : > { %v1426_v41 = vmul.f32 %v1391_v36, %v2207_v58 }
 0x217   : > { %v1395_v42 = vmul.f32 0.5, %v1394_v39  ;;  %v1325_v43 = vpop.xlane.xlu0 %1324 }
 0x218   : > { %v1435_v44 = vmul.f32 %v2227_v45, %v1426_v41  ;;  %v1333_v46 = vmul.f32 0.125, %v1325_v43 }
 0x219   : > { %v1396_v38 = vsub.f32 1.5, %v1395_v42 }
 0x21a   : > { %v1785_v20 = vpop.eup %1784  ;;  %v1444_v48 = vadd.f32 %v2232_v47, %v1435_v44  ;;  %v1341_v49 = vadd.f32 1e-05, %v1333_v46 }
 0x21b   : > { %v1397_v17 = vmul.f32 %v1783_v3, %v1396_v38  ;;  %v1403_v34 = vmul.f32 %v1785_v20, %v1340_v13  ;;  %vm1409_vm5 = vweird.f32 %v1785_v20 }
 0x21c   : > { %1452 = vst [vmem:[%s2239_s27 + $0x20] sm:$0xff] %v1444_v48  ;;  %1786 = vrsqrt.f32 %v1341_v49  ;;  %vm1410_vm7 = vmor %vm1408_vm6, %vm1409_vm5  ;;  %vm1418_vm9 = vweird.f32 %v1341_v49 }
 0x21d   : > { %v1401_v50 = vsel %vm1400_vm4, %v1783_v3, %v1397_v17  ;;  %v1404_v58 = vmul.f32 %v1785_v20, %v1403_v34 }
 0x21e   : > { %v1427_v51 = vmul.f32 %v1401_v50, %v2211_v2 }
 0x21f   : > { %v1405_v53 = vmul.f32 0.5, %v1404_v58 }
 0x220   : > { %v1436_v54 = vmul.f32 %v2227_v45, %v1427_v51 }
 0x221   : > { %v1406_v56 = vsub.f32 1.5, %v1405_v53 }
 0x222   : > { %v1787_v22 = vpop.eup %1786  ;;  %v1445_v57 = vadd.f32 %v2232_v47, %v1436_v54 }
 0x223   : > { %v1407_v61 = vmul.f32 %v1785_v20, %v1406_v56  ;;  %v1413_v62 = vmul.f32 %v1787_v22, %v1341_v49  ;;  %vm1419_vm8 = vweird.f32 %v1787_v22 }
 0x224   : > { %1453 = vst [vmem:[%s2239_s27 + $0x28] sm:$0xff] %v1445_v57  ;;  %vm1420_vm10 = vmor %vm1418_vm9, %vm1419_vm8 }
 0x225   : > { %v1411_v24 = vsel %vm1410_vm7, %v1785_v20, %v1407_v61  ;;  %v1414_v63 = vmul.f32 %v1787_v22, %v1413_v62 }
 0x226   : > { %v1428_v0 = vmul.f32 %v1411_v24, %v2215_v10 }
 0x227   : > { %v1415_v2 = vmul.f32 0.5, %v1414_v63 }
 0x228   : > { %v1437_v14 = vmul.f32 %v2227_v45, %v1428_v0 }
 0x229   : > { %v1416_v21 = vsub.f32 1.5, %v1415_v2 }
 0x22a   : > { %v1446_v26 = vadd.f32 %v2232_v47, %v1437_v14 }
 0x22b   : > { %v1417_v1 = vmul.f32 %v1787_v22, %v1416_v21 }
 0x22c   : > { %1454 = vst [vmem:[%s2239_s27 + $0x30] sm:$0xff] %v1446_v26 }
 0x22d   : > { %v1421_v19 = vsel %vm1420_vm10, %v1787_v22, %v1417_v1 }
 0x22e   : > { %v1429_v4 = vmul.f32 %v1421_v19, %v2219_v11 }
 0x230   : > { %v1438_v5 = vmul.f32 %v2227_v45, %v1429_v4 }
 0x232   : > { %v1447_v6 = vadd.f32 %v2232_v47, %v1438_v5 }
 0x234   : > { %1455 = vst [vmem:[%s2239_s27 + $0x38] sm:$0xff] %v1447_v6 }
 0x235 PF: > { %s16_s23 = sadd.s32 1, %s1810_s23   ;;  %s2287_s21 = smov %s1806_s22 }
 0x236   : > { %p13_p6 = scmp.ge.s32.totalorder %s16_s23, 4   ;;  %s2288_s22 = smov %s2290_s24 }
 0x238   :  { %15 = sbr.rel (!%p13_p6) target bundleno = 2 (0x2), region = 87 }

</bundles_post_ra>
